<compile_context>
chip_gen: v7x
topology: tpu7x:2x2x1
jax: 0.10.0
libtpu: 0.0.40
codegen_flags: <defaults>
</compile_context>

<pallas_src>
import jax
import jax.numpy as jnp
from jax.experimental import pallas as pl
from jax.experimental.pallas import tpu as pltpu


def critic_kernel(x_ref, w1_ref, b1_ref, w2_ref, b2_ref, w3_ref, b3_ref,
                  out_ref):
    """Fused 3-layer MLP on one lane-dense batch tile.

    Shapes (TB = batch tile, always on the lane axis):
      x_ref  : (d_in, TB)  compute dtype (f32 or bf16)
      w1_ref : (128, d_in) compute dtype     b1_ref : (128, 1) f32
      w2_ref : (32, 128)   compute dtype     b2_ref : (32, 1)  f32
      w3_ref : (32, 1)     f32               b3_ref : (1, 1)   f32 (SMEM)
      out_ref: (1, TB)     f32
    """
    cdt = w2_ref.dtype  # matmul operand dtype

    # fc1: single K=d_in matmul (concat already fused in the wrapper).
    h1 = jnp.dot(w1_ref[...], x_ref[...], preferred_element_type=jnp.float32)
    h1 = jnp.maximum(h1 + b1_ref[...], 0.0)                      # (128, TB) f32

    # fc2
    h2 = jnp.dot(w2_ref[...], h1.astype(cdt),
                 preferred_element_type=jnp.float32)
    h2 = jnp.maximum(h2 + b2_ref[...], 0.0)                      # (32, TB) f32

    # fc3: VPU multiply + sublane reduce; result is already lane-dense (1, TB)
    # so the store is a full-width unmasked vst (no sublane->lane relayout).
    z = jnp.sum(h2 * w3_ref[...], axis=0, keepdims=True)
    out_ref[...] = z + b3_ref[0, 0]


def critic_forward(o, a, params, *, tile_b=1024, compute_dtype=None):
    """Fused critic MLP.  o: (B, in_dims), a: (B, out_dims) -> (B, 1) f32."""
    w1, b1, w2, b2, w3, b3 = params
    B, in_dims = o.shape
    out_dims = a.shape[1]
    d_in = in_dims + out_dims
    h1_dim = w1.shape[1]          # 128
    h2_dim = w2.shape[1]          # 32

    if compute_dtype is None:
        compute_dtype = w1.dtype

    # Fused concat + layout flip: batch on the lane axis end-to-end.
    x_t = jnp.concatenate([o, a], axis=1).T.astype(compute_dtype)  # (d_in, B)

    # VMEM-resident transposed weights; biases / fc3 stay in f32 so the whole
    # post-matmul epilogue is f32 (v5e-safe), while MXU operands may be bf16.
    w1_t = w1.T.astype(compute_dtype)                    # (128, d_in)
    w2_t = w2.T.astype(compute_dtype)                    # (32, 128)
    w3_c = w3.reshape(h2_dim, 1).astype(jnp.float32)     # (32, 1)
    b1_c = b1.reshape(h1_dim, 1).astype(jnp.float32)     # (128, 1)
    b2_c = b2.reshape(h2_dim, 1).astype(jnp.float32)     # (32, 1)
    b3_c = b3.reshape(1, 1).astype(jnp.float32)          # (1, 1)  SMEM scalar

    # Lane-dense batch tiles (multiple of 128).  Clamp to ~B/2 so the
    # "parallel" batch axis can split across both TensorCores on v7x; no
    # padding -- the ragged last tile is masked by the Pallas pipeline.
    half_b = pl.cdiv(B, 256) * 128
    tile_b = max(128, min(tile_b, half_b))
    n_tiles = pl.cdiv(B, tile_b)

    out = pl.pallas_call(
        critic_kernel,
        out_shape=jax.ShapeDtypeStruct((1, B), jnp.float32),
        grid=(n_tiles,),
        in_specs=[
            pl.BlockSpec((d_in, tile_b), lambda i: (0, i)),      # x^T tile
            pl.BlockSpec((h1_dim, d_in), lambda i: (0, 0)),      # W1^T resident
            pl.BlockSpec((h1_dim, 1), lambda i: (0, 0)),         # b1
            pl.BlockSpec((h2_dim, h1_dim), lambda i: (0, 0)),    # W2^T resident
            pl.BlockSpec((h2_dim, 1), lambda i: (0, 0)),         # b2
            pl.BlockSpec((h2_dim, 1), lambda i: (0, 0)),         # w3 column
            pl.BlockSpec(memory_space=pltpu.MemorySpace.SMEM),   # b3 scalar
        ],
        out_specs=pl.BlockSpec((1, tile_b), lambda i: (0, i)),
        compiler_params=pltpu.CompilerParams(
            dimension_semantics=("parallel",),
        ),
    )(x_t, w1_t, b1_c, w2_t, b2_c, w3_c, b3_c)

    # Batch is on the lane axis; restore the (B, 1) PyTorch output shape.
    return out[0, :].reshape(B, 1)


def init_params(key, in_dims, out_dims, dtype=jnp.float32):
    """Deterministic synthetic init matching the nn.Linear shapes (transposed)."""
    d_in = in_dims + out_dims
    k1, k2, k3, k4, k5, k6 = jax.random.split(key, 6)
    w1 = (jax.random.normal(k1, (d_in, 128), jnp.float32) * 0.1).astype(dtype)
    b1 = (jax.random.normal(k2, (128,), jnp.float32) * 0.01).astype(dtype)
    w2 = (jax.random.normal(k3, (128, 32), jnp.float32) * 0.1).astype(dtype)
    b2 = (jax.random.normal(k4, (32,), jnp.float32) * 0.01).astype(dtype)
    w3 = (jax.random.normal(k5, (32, 1), jnp.float32) * 0.1).astype(dtype)
    b3 = (jax.random.normal(k6, (1,), jnp.float32) * 0.01).astype(dtype)
    return (w1, b1, w2, b2, w3, b3)


def critic_ref(o, a, params):
    """Pure-JAX reference (full-precision dots) for the correctness check."""
    w1, b1, w2, b2, w3, b3 = params
    hp = jax.lax.Precision.HIGHEST
    x = jnp.concatenate([o, a], axis=1)
    x = jnp.maximum(jnp.dot(x, w1, precision=hp) + b1, 0.0)
    x = jnp.maximum(jnp.dot(x, w2, precision=hp) + b2, 0.0)
    return jnp.dot(x, w3, precision=hp) + b3


# TODO(synk): the torch module also owns an Adam optimizer; only the forward
# pass is implemented here (no training step).

if __name__ == "__main__":
    key = jax.random.PRNGKey(0)
    k_o, k_a, k_p, k_o2, k_a2 = jax.random.split(key, 5)

    batch, in_dims, out_dims = 8, 16, 8
    o = jax.random.normal(k_o, (batch, in_dims), jnp.float32)
    a = jax.random.normal(k_a, (batch, out_dims), jnp.float32)
    params = init_params(k_p, in_dims, out_dims)

    # 1) Small-batch f32 check (single tile, B < 128, ragged lane edge).
    #    Tolerance allows for TPU dot default operand rounding vs. the
    #    HIGHEST-precision reference.
    out = jax.block_until_ready(critic_forward(o, a, params))
    ref = critic_ref(o, a, params)
    assert out.shape == (batch, 1), out.shape
    assert jnp.allclose(out, ref, atol=1e-2, rtol=1e-2)

    # 2) Multi-tile grid with a ragged last tile (300 = 2*128 + 44): exercises
    #    pipelining, the "parallel" batch axis, and the no-pad edge handling.
    batch2 = 300
    o2 = jax.random.normal(k_o2, (batch2, in_dims), jnp.float32)
    a2 = jax.random.normal(k_a2, (batch2, out_dims), jnp.float32)
    out2 = jax.block_until_ready(critic_forward(o2, a2, params, tile_b=128))
    ref2 = critic_ref(o2, a2, params)
    assert out2.shape == (batch2, 1), out2.shape
    assert jnp.allclose(out2, ref2, atol=1e-2, rtol=1e-2)

    # 3) bf16 matmul-operand fast path (v5e/v6e/v7x); accumulation stays f32,
    #    tolerance loosened only for the operand rounding.
    out3 = jax.block_until_ready(
        critic_forward(o2, a2, params, compute_dtype=jnp.bfloat16))
    assert out3.shape == (batch2, 1), out3.shape
    assert jnp.allclose(out3, ref2, atol=5e-2, rtol=5e-2)

    print("KERNEL_OK")
</pallas_src>

<mosaic_0001>
module attributes {stable_mosaic.version = 11 : i64} {
  func.func @critic_kernel(%arg0: i32, %arg1: memref<24x128xf32, #tpu.memory_space<vmem>>, %arg2: memref<128x24xf32, #tpu.memory_space<vmem>>, %arg3: memref<128x1xf32, #tpu.memory_space<vmem>>, %arg4: memref<32x128xf32, #tpu.memory_space<vmem>>, %arg5: memref<32x1xf32, #tpu.memory_space<vmem>>, %arg6: memref<32x1xf32, #tpu.memory_space<vmem>>, %arg7: memref<1x1xf32, #tpu.memory_space<smem>>, %arg8: memref<1x128xf32, #tpu.memory_space<vmem>>) attributes {dimension_semantics = [#tpu.dimension_semantics<parallel>], iteration_bounds = array<i64: 1>, scalar_prefetch = 0 : i64, scratch_operands = 0 : i64, tpu.core_type = #tpu.core_type<tc>, window_params = [{transform_indices = @transform_0, window_bounds = array<i64: 24, 128>}, {pipeline_mode = #tpu.pipeline_mode<synchronous>, transform_indices = @transform_1, window_bounds = array<i64: 128, 24>}, {pipeline_mode = #tpu.pipeline_mode<synchronous>, transform_indices = @transform_2, window_bounds = array<i64: 128, 1>}, {pipeline_mode = #tpu.pipeline_mode<synchronous>, transform_indices = @transform_3, window_bounds = array<i64: 32, 128>}, {pipeline_mode = #tpu.pipeline_mode<synchronous>, transform_indices = @transform_4, window_bounds = array<i64: 32, 1>}, {pipeline_mode = #tpu.pipeline_mode<synchronous>, transform_indices = @transform_5, window_bounds = array<i64: 32, 1>}, {transform_indices = @transform_6, window_bounds = array<i64: 1, 1>}, {transform_indices = @transform_7, window_bounds = array<i64: 1, 128>}]} {
    %c0 = arith.constant 0 : index
    %c0_0 = arith.constant 0 : index
    %0 = vector.load %arg2[%c0, %c0_0] : memref<128x24xf32, #tpu.memory_space<vmem>>, vector<128x24xf32>
    %c0_1 = arith.constant 0 : index
    %c0_2 = arith.constant 0 : index
    %1 = vector.load %arg1[%c0_1, %c0_2] : memref<24x128xf32, #tpu.memory_space<vmem>>, vector<24x128xf32>
    %cst = arith.constant dense<0.000000e+00> : vector<128x128xf32>
    %2 = tpu.matmul %0, %1, %cst {dimension_numbers = #tpu.dot_dimension_numbers<[1], [0], [0], [1], [0, 0, 1, 1], [], []>} : vector<128x24xf32>, vector<24x128xf32>, vector<128x128xf32> -> vector<128x128xf32>
    %c0_3 = arith.constant 0 : index
    %c0_4 = arith.constant 0 : index
    %3 = vector.load %arg3[%c0_3, %c0_4] : memref<128x1xf32, #tpu.memory_space<vmem>>, vector<128x1xf32>
    %4 = vector.broadcast %3 : vector<128x1xf32> to vector<128x128xf32>
    %5 = arith.addf %2, %4 : vector<128x128xf32>
    %cst_5 = arith.constant 0.000000e+00 : f32
    %6 = vector.broadcast %cst_5 : f32 to vector<128x128xf32>
    %7 = arith.maximumf %5, %6 : vector<128x128xf32>
    %c0_6 = arith.constant 0 : index
    %c0_7 = arith.constant 0 : index
    %8 = vector.load %arg4[%c0_6, %c0_7] : memref<32x128xf32, #tpu.memory_space<vmem>>, vector<32x128xf32>
    %cst_8 = arith.constant dense<0.000000e+00> : vector<32x128xf32>
    %9 = tpu.matmul %8, %7, %cst_8 {dimension_numbers = #tpu.dot_dimension_numbers<[1], [0], [0], [1], [0, 0, 1, 1], [], []>} : vector<32x128xf32>, vector<128x128xf32>, vector<32x128xf32> -> vector<32x128xf32>
    %c0_9 = arith.constant 0 : index
    %c0_10 = arith.constant 0 : index
    %10 = vector.load %arg5[%c0_9, %c0_10] : memref<32x1xf32, #tpu.memory_space<vmem>>, vector<32x1xf32>
    %11 = vector.broadcast %10 : vector<32x1xf32> to vector<32x128xf32>
    %12 = arith.addf %9, %11 : vector<32x128xf32>
    %cst_11 = arith.constant 0.000000e+00 : f32
    %13 = vector.broadcast %cst_11 : f32 to vector<32x128xf32>
    %14 = arith.maximumf %12, %13 : vector<32x128xf32>
    %c0_12 = arith.constant 0 : index
    %c0_13 = arith.constant 0 : index
    %15 = vector.load %arg6[%c0_12, %c0_13] : memref<32x1xf32, #tpu.memory_space<vmem>>, vector<32x1xf32>
    %16 = vector.broadcast %15 : vector<32x1xf32> to vector<32x128xf32>
    %17 = arith.mulf %14, %16 : vector<32x128xf32>
    %cst_14 = arith.constant dense<0.000000e+00> : vector<128xf32>
    %18 = vector.multi_reduction <add>, %17, %cst_14 [0] : vector<32x128xf32> to vector<128xf32>
    %19 = vector.shape_cast %18 : vector<128xf32> to vector<1x128xf32>
    %c0_15 = arith.constant 0 : index
    %c0_16 = arith.constant 0 : index
    %20 = memref.load %arg7[%c0_15, %c0_16] : memref<1x1xf32, #tpu.memory_space<smem>>
    %21 = vector.broadcast %20 : f32 to vector<1x128xf32>
    %22 = arith.addf %19, %21 : vector<1x128xf32>
    %c0_17 = arith.constant 0 : index
    %c0_18 = arith.constant 0 : index
    %23 = vector.load %arg8[%c0_17, %c0_18] : memref<1x128xf32, #tpu.memory_space<vmem>>, vector<1x128xf32>
    tpu.vector_store %arg8[%c0_17, %c0_18], %22 {strides = array<i32>} : memref<1x128xf32, #tpu.memory_space<vmem>>, vector<1x128xf32>,
    return
  }
  func.func @transform_0(%arg0: i32) -> (i32, i32) {
    %c0_i32 = arith.constant 0 : i32
    %c0_i32_0 = arith.constant 0 : i32
    return %c0_i32, %arg0 : i32, i32
  }
  func.func @transform_1(%arg0: i32) -> (i32, i32) {
    %c0_i32 = arith.constant 0 : i32
    %c0_i32_0 = arith.constant 0 : i32
    %c0_i32_1 = arith.constant 0 : i32
    return %c0_i32, %c0_i32_0 : i32, i32
  }
  func.func @transform_2(%arg0: i32) -> (i32, i32) {
    %c0_i32 = arith.constant 0 : i32
    %c0_i32_0 = arith.constant 0 : i32
    %c0_i32_1 = arith.constant 0 : i32
    return %c0_i32, %c0_i32_0 : i32, i32
  }
  func.func @transform_3(%arg0: i32) -> (i32, i32) {
    %c0_i32 = arith.constant 0 : i32
    %c0_i32_0 = arith.constant 0 : i32
    %c0_i32_1 = arith.constant 0 : i32
    return %c0_i32, %c0_i32_0 : i32, i32
  }
  func.func @transform_4(%arg0: i32) -> (i32, i32) {
    %c0_i32 = arith.constant 0 : i32
    %c0_i32_0 = arith.constant 0 : i32
    %c0_i32_1 = arith.constant 0 : i32
    return %c0_i32, %c0_i32_0 : i32, i32
  }
  func.func @transform_5(%arg0: i32) -> (i32, i32) {
    %c0_i32 = arith.constant 0 : i32
    %c0_i32_0 = arith.constant 0 : i32
    %c0_i32_1 = arith.constant 0 : i32
    return %c0_i32, %c0_i32_0 : i32, i32
  }
  func.func @transform_6(%arg0: i32) -> (i32, i32) {
    %c0_i32 = arith.constant 0 : i32
    %c0_i32_0 = arith.constant 0 : i32
    %c0_i32_1 = arith.constant 0 : i32
    return %c0_i32, %c0_i32_0 : i32, i32
  }
  func.func @transform_7(%arg0: i32) -> (i32, i32) {
    %c0_i32 = arith.constant 0 : i32
    %c0_i32_0 = arith.constant 0 : i32
    return %c0_i32, %arg0 : i32, i32
  }
}

</mosaic_0001>

<bundles_post_ra>
// kernel: tpu_custom_call.1
= control target key start
LH: loop header
LB: loop body
LE: loop exit
PB: predicated region body
PF: predicated region fallthrough
CT: control target
= control target key end

     0   :  { %vm143_vm0 = vcmask 195584   ;;  %v712_v4 = vmov 0   ;;  %s926_s0 = inlined_call_operand.vmem [shape: f32[24,8], index: 0, kind: input, shape index: {}]   ;;  %s927_s1 = inlined_call_operand.vmem [shape: f32[128,24], index: 1, kind: input, shape index: {}]   ;;  %s928_s2 = inlined_call_operand.vmem [shape: f32[128,1], index: 2, kind: input, shape index: {}]   ;;  %s929_s3 = inlined_call_operand.vmem [shape: f32[32,128], index: 3, kind: input, shape index: {}]   ;;  %s930_s4 = inlined_call_operand.vmem [shape: f32[32,1], index: 4, kind: input, shape index: {}]   ;;  %s931_s5 = inlined_call_operand.vmem [shape: f32[32,1], index: 5, kind: input, shape index: {}]   ;;  %s932_s6 = inlined_call_operand.<no memory space> [shape: f32[1,1], index: 6, kind: input, shape index: {}]   ;;  %s933_s7 = inlined_call_operand.hbm [shape: f32[1,8], index: 7, kind: output, shape index: {}]  }
   0x1   :  { %v44_v0 = vld [vmem:[%s926_s0] sm:$0xff]  ;;  %v45_v1 = vld [vmem:[%s926_s0 + $0x8] sm:$0xff]  ;;  %686 = vset.pattern.permute.xlu0 %v712_v4  ;;  %687 = vset.pattern.permute.xlu1 %v712_v4  ;;  %v46_v5 = vld [vmem:[%s926_s0 + $0x10] sm:$0xff] }
   0x2   :  { %v648_v2 = vpack.c.bf16 %v45_v1, %v44_v0  ;;  %v28_v3 = vld [vmem:[%s927_s1] sm:$0xff]  ;;  %v29_v6 = vld [vmem:[%s927_s1 + $0x8] sm:$0xff]  ;;  %v49_v8 = vld [vmem:[%s928_s2 + $0x10] sm:$0xff] }
   0x3   :  { %586 = vmatprep.mubr.msk.f32.mxu0 %vm143_vm0, %v28_v3  ;;  %v47_v7 = vld [vmem:[%s928_s2] sm:$0xff]  ;;  %v30_v9 = vld [vmem:[%s927_s1 + $0x10] sm:$0xff]  ;;  %75 = vperm.xlu1 %687, %v49_v8   ;;  %v48_v10 = vld [vmem:[%s928_s2 + $0x8] sm:$0xff] }
   0x4   :  { %649 = vmatprep.subr.bf16.mxu0 %v648_v2  ;;  %65 = vperm.xlu0 %686, %v47_v7   ;;  %v50_v11 = vld [vmem:[%s928_s2 + $0x18] sm:$0xff]  ;;  %v32_v13 = vld [vmem:[%s927_s1 + $0x20] sm:$0xff]  ;;  %v52_v15 = vld [vmem:[%s928_s2 + $0x28] sm:$0xff] }
   0x5   :  { %651 = vmatpush3.bf16.msra.mxu0 %v648_v2  ;;  %v31_v12 = vld [vmem:[%s927_s1 + $0x18] sm:$0xff]  ;;  %v51_v14 = vld [vmem:[%s928_s2 + $0x20] sm:$0xff]  ;;  %v33_v16 = vld [vmem:[%s927_s1 + $0x28] sm:$0xff] }
   0x6   :  { %584 = vmatprep.subr.mxu0 %v46_v5 }
   0x7   :  { %80 = vperm.xlu1 %687, %v50_v11  }
   0x8   :  { %70 = vperm.xlu0 %686, %v48_v10  }
   0x9   :  { %585 = vmatpush3.msra.mxu0 %v46_v5 }
   0xa   :  { %587 = vmatmul.mubr.msk.f32.vlgmr.msra.gmra.mrb[0].mxu0 %vm143_vm0, %v29_v6 }
   0xb   :  { %589 = vmatprep.mubr.msk.f32.mxu0 %vm143_vm0, %v30_v9 }
   0xe   :  { %590 = vmatmul.mubr.msk.f32.gmra.mrb[2].mxu0 %vm143_vm0, %v31_v12 }
   0xf   :  { %592 = vmatprep.mubr.msk.f32.mxu0 %vm143_vm0, %v32_v13 }
  0x10   :  { %13 = vsyncpa [#allocation4], 0  ;;  %v34_v17 = vld [vmem:[%s927_s1 + $0x30] sm:$0xff]  ;;  %85 = vperm.xlu0 %686, %v51_v14   ;;  %90 = vperm.xlu1 %687, %v52_v15   ;;  %v54_v19 = vld [vmem:[%s928_s2 + $0x38] sm:$0xff]  ;;  %s713_s19 = smov [#allocation3]  }
  0x11   :  { %v53_v18 = vld [vmem:[%s928_s2 + $0x30] sm:$0xff]  ;;  %v35_v20 = vld [vmem:[%s927_s1 + $0x38] sm:$0xff]  ;;  %v36_v21 = vld [vmem:[%s927_s1 + $0x40] sm:$0xff]  ;;  %s517_s20 = sshll.u32 %s713_s19, 4  ;;  %s518_s20 = int_to_ptr.vmem [resolvable:$true] %s517_s20 }
  0x12   :  { %593 = vmatmul.mubr.msk.f32.gmra.mrb[4].mxu0 %vm143_vm0, %v33_v16  ;;  %v55_v22 = vld [vmem:[%s928_s2 + $0x40] sm:$0xff]  ;;  %v56_v23 = vld [vmem:[%s928_s2 + $0x48] sm:$0xff]  ;;  %v38_v25 = vld [vmem:[%s927_s1 + $0x50] sm:$0xff]  ;;  %s688_s21 = scalar_lea.vmem %s518_s20, 16  ;;  %s692_s22 = scalar_lea.vmem %s518_s20, 32 }
  0x13   :  { %595 = vmatprep.mubr.msk.f32.mxu0 %vm143_vm0, %v34_v17  ;;  %v37_v24 = vld [vmem:[%s927_s1 + $0x48] sm:$0xff]  ;;  %v57_v26 = vld [vmem:[%s928_s2 + $0x50] sm:$0xff]  ;;  %v58_v27 = vld [vmem:[%s928_s2 + $0x58] sm:$0xff]  ;;  %p689_p0 = scmp.ne.s32.totalorder %s518_s20, %s688_s21  ;;  %p693_p1 = scmp.lt.s32.totalorder %s518_s20, %s518_s20 }
  0x14   :  { %95 = vperm.xlu0 %686, %v53_v18   ;;  %100 = vperm.xlu1 %687, %v54_v19   ;;  %v39_v28 = vld [vmem:[%s927_s1 + $0x58] sm:$0xff]  ;;  %v40_v29 = vld [vmem:[%s927_s1 + $0x60] sm:$0xff]  ;;  %v60_v31 = vld [vmem:[%s928_s2 + $0x68] sm:$0xff]  ;;  %p694_p2 = scmp.lt.s32.totalorder %s692_s22, %s688_s21 }
  0x15   :  { %v59_v30 = vld [vmem:[%s928_s2 + $0x60] sm:$0xff]  ;;  %v41_v32 = vld [vmem:[%s927_s1 + $0x68] sm:$0xff]  ;;  %v42_v33 = vld [vmem:[%s927_s1 + $0x70] sm:$0xff] }
  0x16   :  { %596 = vmatmul.mubr.msk.f32.gmra.mrb[6].mxu0 %vm143_vm0, %v35_v20  ;;  %v61_v34 = vld [vmem:[%s928_s2 + $0x70] sm:$0xff]  ;;  %v62_v35 = vld [vmem:[%s928_s2 + $0x78] sm:$0xff]  ;;  %v357_v37 = vld [vmem:[%s930_s4] sm:$0xff]  ;;  %p695_p3 = por %p694_p2, %p693_p1 }
  0x17   :  { %598 = vmatprep.mubr.msk.f32.mxu0 %vm143_vm0, %v36_v21  ;;  %v43_v36 = vld [vmem:[%s927_s1 + $0x78] sm:$0xff]  ;;  %v358_v38 = vld [vmem:[%s930_s4 + $0x8] sm:$0xff]  ;;  %v359_v39 = vld [vmem:[%s930_s4 + $0x10] sm:$0xff] }
  0x18   :  { %105 = vperm.xlu0 %686, %v55_v22   ;;  %110 = vperm.xlu1 %687, %v56_v23   ;;  %v360_v40 = vld [vmem:[%s930_s4 + $0x18] sm:$0xff]  ;;  %v470_v41 = vld [vmem:[%s931_s5] sm:$0xff]  ;;  %v471_v42 = vld [vmem:[%s931_s5 + $0x8] sm:$0xff]  ;;  %p696_p4 = pnand %p695_p3, %p689_p0 }
  0x19   :  { %v472_v43 = vld [vmem:[%s931_s5 + $0x10] sm:$0xff]  ;;  %v473_v44 = vld [vmem:[%s931_s5 + $0x18] sm:$0xff]  ;;  %v353_v45 = vld [vmem:[%s929_s3] sm:$0xff] }
  0x1a   :  { %599 = vmatmul.mubr.msk.f32.gmra.mrb[8].mxu0 %vm143_vm0, %v37_v24  ;;  %642 = vmatprep.mubr.f32.mxu1 %v353_v45 }
  0x1b   :  { %601 = vmatprep.mubr.msk.f32.mxu0 %vm143_vm0, %v38_v25 }
  0x1c   :  { %115 = vperm.xlu0 %686, %v57_v26   ;;  %120 = vperm.xlu1 %687, %v58_v27  }
  0x1e   :  { %602 = vmatmul.mubr.msk.f32.gmra.mrb[10].mxu0 %vm143_vm0, %v39_v28 }
  0x1f   :  { %604 = vmatprep.mubr.msk.f32.mxu0 %vm143_vm0, %v40_v29 }
  0x20   :  { %125 = vperm.xlu0 %686, %v59_v30   ;;  %130 = vperm.xlu1 %687, %v60_v31  }
  0x22   :  { %605 = vmatmul.mubr.msk.f32.gmra.mrb[12].mxu0 %vm143_vm0, %v41_v32 }
  0x23   :  { %607 = vmatprep.mubr.msk.f32.mxu0 %vm143_vm0, %v42_v33 }
  0x24   :  { %135 = vperm.xlu0 %686, %v61_v34   ;;  %140 = vperm.xlu1 %687, %v62_v35  }
  0x26   :  { %608 = vmatmul.mubr.msk.f32.gmra.mrb[14].mxu0 %vm143_vm0, %v43_v36 }
  0x28   :  { %363 = vperm.xlu0 %686, %v357_v37   ;;  %368 = vperm.xlu1 %687, %v358_v38  }
  0x2c   :  { %373 = vperm.xlu0 %686, %v359_v39   ;;  %378 = vperm.xlu1 %687, %v360_v40  }
  0x30   :  { %476 = vperm.xlu0 %686, %v470_v41   ;;  %481 = vperm.xlu1 %687, %v471_v42  }
  0x34   :  { %486 = vperm.xlu0 %686, %v472_v43   ;;  %491 = vperm.xlu1 %687, %v473_v44  }
  0x82   :  { %v76_v46 = vpop.permute.xlu1 %75 }
  0x83   :  { %v66_v47 = vpop.permute.xlu0 %65 }
  0x86   :  { %v81_v48 = vpop.permute.xlu1 %80 }
  0x87   :  { %v71_v49 = vpop.permute.xlu0 %70 }
  0x8f   :  { %v91_v50 = vpop.permute.xlu1 %90  ;;  %v86_v51 = vpop.permute.xlu0 %85 }
  0x93   :  { %v101_v57 = vpop.permute.xlu1 %100  ;;  %v96_v60 = vpop.permute.xlu0 %95 }
  0x97   :  { %v111_v6 = vpop.permute.xlu1 %110  ;;  %v106_v9 = vpop.permute.xlu0 %105 }
  0x9b   :  { %v121_v18 = vpop.permute.xlu1 %120  ;;  %v116_v21 = vpop.permute.xlu0 %115 }
  0x9f   :  { %v131_v31 = vpop.permute.xlu1 %130  ;;  %v126_v34 = vpop.permute.xlu0 %125 }
  0xa3   :  { %v141_v43 = vpop.permute.xlu1 %140 }
  0xdd   :  { %v588_v52 = vpop.f32.mrb[0].mxu0 }
  0xde   :  { %v264_v53 = vadd.f32 %v588_v52, %v71_v49  ;;  %v258_v54 = vpop.f32.mrb[1].mxu0 }
  0xdf   :  { %v259_v55 = vadd.f32 %v258_v54, %v66_v47  ;;  %v354_v54 = vld [vmem:[%s929_s3 + $0x8] sm:$0xff] }
  0xe0   :  { %v338_v56 = vmax.f32 %v264_v53, 0.0 }
  0xe1   :  { %v337_v58 = vmax.f32 %v259_v55, 0.0  ;;  %v591_v59 = vpop.f32.mrb[2].mxu0  ;;  %v355_v55 = vld [vmem:[%s929_s3 + $0x10] sm:$0xff] }
  0xe2   :  { %v274_v61 = vadd.f32 %v591_v59, %v81_v48  ;;  %v268_v62 = vpop.f32.mrb[3].mxu0 }
  0xe3   :  { %v269_v63 = vadd.f32 %v268_v62, %v76_v46  ;;  %v652_v0 = vpack.c.bf16 %v338_v56, %v337_v58  ;;  %v136_v46 = vpop.permute.xlu0 %135  ;;  %v356_v56 = vld [vmem:[%s929_s3 + $0x18] sm:$0xff]  ;;  %v369_v58 = vpop.permute.xlu1 %368 }
  0xe4   :  { %v340_v1 = vmax.f32 %v274_v61, 0.0 }
  0xe5   :  { %v339_v2 = vmax.f32 %v269_v63, 0.0  ;;  %v594_v3 = vpop.f32.mrb[4].mxu0  ;;  %653 = vmatprep.subr.bf16.mxu1 %v652_v0 }
  0xe6   :  { %v284_v4 = vadd.f32 %v594_v3, %v91_v50  ;;  %v278_v5 = vpop.f32.mrb[5].mxu0  ;;  %655 = vmatpush3.bf16.msra.mxu1 %v652_v0 }
  0xe7   :  { %v656_v7 = vpack.c.bf16 %v340_v1, %v339_v2  ;;  %v279_v8 = vadd.f32 %v278_v5, %v86_v51 }
  0xe8   :  { %v342_v10 = vmax.f32 %v284_v4, 0.0 }
  0xe9   :  { %v341_v11 = vmax.f32 %v279_v8, 0.0  ;;  %v597_v12 = vpop.f32.mrb[6].mxu0  ;;  %657 = vmatprep.subr.bf16.mxu1 %v656_v7 }
  0xea   :  { %v294_v13 = vadd.f32 %v597_v12, %v101_v57  ;;  %v288_v14 = vpop.f32.mrb[7].mxu0  ;;  %659 = vmatpush3.bf16.msra.mxu1 %v656_v7  ;;  %v364_v57 = vpop.permute.xlu0 %363 }
  0xeb   :  { %v660_v15 = vpack.c.bf16 %v342_v10, %v341_v11  ;;  %v289_v16 = vadd.f32 %v288_v14, %v96_v60  ;;  %v379_v60 = vpop.permute.xlu1 %378 }
  0xec   :  { %v344_v17 = vmax.f32 %v294_v13, 0.0 }
  0xed   :  { %v343_v19 = vmax.f32 %v289_v16, 0.0  ;;  %v600_v20 = vpop.f32.mrb[8].mxu0  ;;  %661 = vmatprep.subr.bf16.mxu1 %v660_v15 }
  0xee   :  { %v304_v22 = vadd.f32 %v600_v20, %v111_v6  ;;  %v298_v23 = vpop.f32.mrb[9].mxu0  ;;  %663 = vmatpush3.bf16.msra.mxu1 %v660_v15  ;;  %v374_v59 = vpop.permute.xlu0 %373 }
  0xef   :  { %v664_v24 = vpack.c.bf16 %v344_v17, %v343_v19  ;;  %v299_v25 = vadd.f32 %v298_v23, %v106_v9  ;;  %v482_v3 = vpop.permute.xlu1 %481 }
  0xf0   :  { %v346_v26 = vmax.f32 %v304_v22, 0.0 }
  0xf1   :  { %v345_v27 = vmax.f32 %v299_v25, 0.0  ;;  %v603_v28 = vpop.f32.mrb[10].mxu0  ;;  %665 = vmatprep.subr.bf16.mxu1 %v664_v24  ;;  %v508_v25 = vstv %s932_s6 }
  0xf2   :  { %v314_v29 = vadd.f32 %v603_v28, %v121_v18  ;;  %v308_v30 = vpop.f32.mrb[11].mxu0  ;;  %667 = vmatpush3.bf16.msra.mxu1 %v664_v24  ;;  %v477_v1 = vpop.permute.xlu0 %476 }
  0xf3   :  { %v668_v32 = vpack.c.bf16 %v346_v26, %v345_v27  ;;  %v309_v33 = vadd.f32 %v308_v30, %v116_v21  ;;  %v492_v16 = vpop.permute.xlu1 %491 }
  0xf4   :  { %v348_v35 = vmax.f32 %v314_v29, 0.0 }
  0xf5   :  { %v347_v36 = vmax.f32 %v309_v33, 0.0  ;;  %v606_v37 = vpop.f32.mrb[12].mxu0  ;;  %669 = vmatprep.subr.bf16.mxu1 %v668_v32 }
  0xf6   :  { %v324_v38 = vadd.f32 %v606_v37, %v131_v31  ;;  %v318_v39 = vpop.f32.mrb[13].mxu0  ;;  %671 = vmatpush3.bf16.msra.mxu1 %v668_v32  ;;  %v487_v14 = vpop.permute.xlu0 %486 }
  0xf7   :  { %v672_v40 = vpack.c.bf16 %v348_v35, %v347_v36  ;;  %v319_v41 = vadd.f32 %v318_v39, %v126_v34 }
  0xf8   :  { %v350_v42 = vmax.f32 %v324_v38, 0.0 }
  0xf9   :  { %v349_v44 = vmax.f32 %v319_v41, 0.0  ;;  %v609_v45 = vpop.f32.mrb[14].mxu0  ;;  %673 = vmatprep.subr.bf16.mxu1 %v672_v40 }
  0xfa   :  { %v334_v47 = vadd.f32 %v609_v45, %v141_v43  ;;  %v328_v48 = vpop.f32.mrb[15].mxu0  ;;  %675 = vmatpush3.bf16.msra.mxu1 %v672_v40 }
  0xfb   :  { %v676_v49 = vpack.c.bf16 %v350_v42, %v349_v44  ;;  %v329_v50 = vadd.f32 %v328_v48, %v136_v46 }
  0xfc   :  { %v352_v51 = vmax.f32 %v334_v47, 0.0 }
  0xfd   :  { %v351_v52 = vmax.f32 %v329_v50, 0.0  ;;  %677 = vmatprep.subr.bf16.mxu1 %v676_v49 }
  0xfe   :  { %679 = vmatpush3.bf16.msra.mxu1 %v676_v49 }
  0xff   :  { %v680_v53 = vpack.c.bf16 %v352_v51, %v351_v52 }
 0x101   :  { %681 = vmatprep.subr.bf16.mxu1 %v680_v53 }
 0x102   :  { %683 = vmatpush3.bf16.msra.mxu1 %v680_v53 }
 0x105   :  { %643 = vmatmul.mubr.f32.vlgmr.msra.gmra.mrb[0].mxu1 %v354_v54 }
 0x106   :  { %645 = vmatprep.mubr.f32.mxu1 %v355_v55 }
 0x109   :  { %646 = vmatmul.mubr.f32.gmra.mrb[2].mxu1 %v356_v56 }
 0x1d8   :  { %v644_v61 = vpop.f32.mrb[0].mxu1 }
 0x1d9   :  { %v453_v62 = vadd.f32 %v644_v61, %v369_v58  ;;  %v447_v63 = vpop.f32.mrb[1].mxu1 }
 0x1da   :  { %v448_v0 = vadd.f32 %v447_v63, %v364_v57 }
 0x1db   :  { %v467_v2 = vmax.f32 %v453_v62, 0.0 }
 0x1dc   :  { %v466_v4 = vmax.f32 %v448_v0, 0.0  ;;  %v647_v5 = vpop.f32.mrb[2].mxu1 }
 0x1dd   :  { %v495_v6 = vmul.f32 %v482_v3, %v467_v2  ;;  %v463_v7 = vadd.f32 %v647_v5, %v379_v60  ;;  %v457_v8 = vpop.f32.mrb[3].mxu1 }
 0x1de   :  { %v494_v9 = vmul.f32 %v477_v1, %v466_v4  ;;  %v458_v10 = vadd.f32 %v457_v8, %v374_v59 }
 0x1df   :  { %v469_v12 = vmax.f32 %v463_v7, 0.0 }
 0x1e0   :  { %v498_v11 = vadd.f32 %v495_v6, %v494_v9  ;;  %v468_v13 = vmax.f32 %v458_v10, 0.0 }
 0x1e1   :  { %v497_v17 = vmul.f32 %v492_v16, %v469_v12 }
 0x1e2   :  { %v496_v15 = vmul.f32 %v487_v14, %v468_v13 }
 0x1e4   :  { %v499_v18 = vadd.f32 %v498_v11, %v496_v15 }
 0x1e6   :  { %v500_v19 = vadd.f32 %v499_v18, %v497_v17 }
 0x1e8   :  { %v501_v20 = vrot.slane %v500_v19, 4 }
 0x1ea   :  { %v502_v21 = vadd.f32 %v501_v20, %v500_v19 }
 0x1ec   :  { %v503_v22 = vrot.slane %v502_v21, 2 }
 0x1ee   :  { %v504_v23 = vadd.f32 %v503_v22, %v502_v21 }
 0x1f0   :  { %v505_v24 = vrot.slane %v504_v23, 1 }
 0x1f2   :  { %v506_v26 = vadd.f32 %v505_v24, %v504_v23 }
 0x1f4   :  { %v509_v27 = vadd.f32 %v508_v25, %v506_v26 }
 0x1f6   :  { %510 = vst [vmem:[#allocation3] sm:$0x1] %v509_v27 }
 0x1f7   :  { %699 = shalt.err (!%p696_p4)
}
 0x1f8   :  { %s700_s25 = scalar_lea.hbm %s933_s7, 16 }
 0x1f9   :  { %p701_p5 = scmp.ne.s32.totalorder %s933_s7, %s700_s25  ;;  %p704_p6 = scmp.lt.u32.totalorder %s700_s25, %s933_s7 }
 0x1fb   :  { %p706_p7 = pnand %p704_p6, %p701_p5 }
 0x1fd   :  { %709 = shalt.err (!%p706_p7)
}
 0x1fe   :  { %520 = dma.vmem_to_hbm [thread:$0]  %s518_s20, 16, %s933_s7, [#allocation4]  }
 0x1ff   :  { %710 = dma.done.wait [#allocation4], 16  }
 0x200   :  { %711 = vsyncadd [#allocation4], 4294967280 }
 0x201   :  { %524 = vsyncpa [#allocation4], 1 }

</bundles_post_ra>
